<compile_context>
chip_gen: v6e
topology: v6e:2x2x1
jax: 0.10.0
libtpu: 0.0.40
codegen_flags: <defaults>
</compile_context>

<pallas_src>
import math
from functools import partial

import jax
import jax.numpy as jnp
from jax.experimental import pallas as pl
from jax.experimental.pallas import tpu as pltpu


def make_positional_encoding(max_length: int, n_hidden: int) -> jnp.ndarray:
    """Replicates the PyTorch __init__ buffer exactly (c = raw column index):
         pe[pos, c] = sin(pos / 10000**(2*c/H))  for even c
                      cos(pos / 10000**(2*c/H))  for odd  c
    """
    pos = jnp.arange(max_length, dtype=jnp.float32)[:, None]       # (L, 1)
    col = jnp.arange(n_hidden, dtype=jnp.float32)[None, :]         # (1, H)
    angle = pos / jnp.power(10000.0, 2.0 * col / n_hidden)         # (L, H)
    is_even = (jnp.arange(n_hidden) % 2 == 0)[None, :]
    return jnp.where(is_even, jnp.sin(angle), jnp.cos(angle))


def _pos_enc_kernel(x_ref, pe_ref, o_ref, *, scale: float):
    # Pure VPU work (one mul + one add per element).  Explicit cast on the
    # store so bf16/fp16 activations never produce a mixed-dtype store.
    o_ref[...] = (x_ref[...] * scale + pe_ref[...]).astype(o_ref.dtype)


def _choose_seq_tile(S: int, H: int, itemsize: int,
                     target_bytes: int = 1 << 20) -> int:
    """Pick a sequence tile TS such that:
         * TS divides S and is a multiple of the sublane granularity
           (8 rows for 32-bit, 16 for 16-bit, 32 for 8-bit dtypes), and
         * the (TS, H) block is <= target_bytes (~1 MiB: measured ~85% of HBM
           roofline for elementwise ops, and 3 streams x 2 buffers x 1 MiB
           fits every generation's default scoped VMEM).
       Falls back to TS = S (full-extent block dims are always legal)."""
    gran = 8 * max(1, 4 // max(itemsize, 1))
    if S % gran != 0:
        return S
    rows_per_target = max(
        gran, (target_bytes // max(H * itemsize, 1)) // gran * gran)
    best = gran
    for ts in range(gran, S + 1, gran):
        if S % ts == 0 and ts <= rows_per_target:
            best = ts
    return best


def positional_encoder(x, pe, *, n_hidden: int, seq_tile: int | None = None):
    """x: [B, S, H];  pe: [max_length, H] buffer.  Returns x*sqrt(H) + pe[:S]."""
    B, S, H = x.shape
    scale = math.sqrt(n_hidden)

    # Host glue mirroring the module: slice pe[:, :seq_len].  Cast ONCE to the
    # activation dtype so the kernel streams pe at the same width as x.
    pe_s = pe[:S, :].astype(x.dtype).reshape(1, S, H)

    if seq_tile is None:
        seq_tile = _choose_seq_tile(S, H, jnp.dtype(x.dtype).itemsize)
    ts = seq_tile
    assert S % ts == 0 and (ts % 8 == 0 or ts == S), (S, ts)

    # Batch innermost: pe's block index is constant across consecutive steps,
    # so its DMA is skipped — pe is fetched once per sequence tile.
    grid = (S // ts, B)
    blk = (1, ts, H)

    kernel = partial(_pos_enc_kernel, scale=scale)
    return pl.pallas_call(
        kernel,
        out_shape=jax.ShapeDtypeStruct((B, S, H), x.dtype),
        grid_spec=pltpu.PrefetchScalarGridSpec(
            num_scalar_prefetch=0,
            grid=grid,
            in_specs=[
                pl.BlockSpec(blk, lambda s, b: (b, s, 0)),   # x
                pl.BlockSpec(blk, lambda s, b: (0, s, 0)),   # pe (batch-independent)
            ],
            out_specs=pl.BlockSpec(blk, lambda s, b: (b, s, 0)),
        ),
        compiler_params=pltpu.CompilerParams(
            dimension_semantics=("parallel", "parallel")),
    )(x, pe_s)


def _reference(x, pe, *, n_hidden: int):
    """Pure-JAX reference mirroring the PyTorch forward."""
    S = x.shape[1]
    return x * math.sqrt(n_hidden) + pe[None, :S, :].astype(x.dtype)


if __name__ == "__main__":
    key = jax.random.PRNGKey(0)

    # --- Test 1: lane-dense hidden dim (H multiple of 128), tiled seq axis ---
    B, S, H = 2, 16, 128
    max_length = 32
    x = jax.random.normal(key, (B, S, H), jnp.float32)
    pe = make_positional_encoding(max_length, H)

    out = jax.block_until_ready(positional_encoder(x, pe, n_hidden=H))
    ref = _reference(x, pe, n_hidden=H)
    assert out.shape == (B, S, H)
    assert jnp.allclose(out, ref, atol=1e-5, rtol=1e-5), "f32 mismatch vs reference"

    # --- Test 2: small hidden dim (H=32, S=8) through the same code path ---
    B2, S2, H2 = 2, 8, 32
    x2 = jax.random.normal(jax.random.PRNGKey(0), (B2, S2, H2), jnp.float32)
    pe2 = make_positional_encoding(16, H2)
    out2 = jax.block_until_ready(positional_encoder(x2, pe2, n_hidden=H2))
    ref2 = _reference(x2, pe2, n_hidden=H2)
    assert jnp.allclose(out2, ref2, atol=1e-5, rtol=1e-5), "small-H mismatch vs reference"

    # --- Test 3: bf16 activations (exercises pe dtype cast + store cast) ---
    x3 = x.astype(jnp.bfloat16)
    out3 = jax.block_until_ready(positional_encoder(x3, pe, n_hidden=H))
    assert out3.dtype == jnp.bfloat16
    assert jnp.allclose(out3.astype(jnp.float32), ref, atol=0.2, rtol=0.05), \
        "bf16 mismatch vs reference"

    print("KERNEL_OK")
</pallas_src>

<mosaic_0001>
module attributes {stable_mosaic.version = 11 : i64} {
  func.func @_pos_enc_kernel(%arg0: i32, %arg1: i32, %arg2: memref<1x16x128xf32, #tpu.memory_space<vmem>>, %arg3: memref<1x16x128xf32, #tpu.memory_space<vmem>>, %arg4: memref<1x16x128xf32, #tpu.memory_space<vmem>>) attributes {dimension_semantics = [#tpu.dimension_semantics<parallel>, #tpu.dimension_semantics<parallel>], iteration_bounds = array<i64: 1, 2>, scalar_prefetch = 0 : i64, scratch_operands = 0 : i64, tpu.core_type = #tpu.core_type<tc>, window_params = [{transform_indices = @transform_0, window_bounds = array<i64: 1, 16, 128>}, {transform_indices = @transform_1, window_bounds = array<i64: 1, 16, 128>}, {transform_indices = @transform_2, window_bounds = array<i64: 1, 16, 128>}]} {
    %c0 = arith.constant 0 : index
    %c0_0 = arith.constant 0 : index
    %c0_1 = arith.constant 0 : index
    %0 = vector.load %arg2[%c0, %c0_0, %c0_1] : memref<1x16x128xf32, #tpu.memory_space<vmem>>, vector<1x16x128xf32>
    %cst = arith.constant 11.3137083 : f32
    %1 = vector.broadcast %cst : f32 to vector<1x16x128xf32>
    %2 = arith.mulf %0, %1 : vector<1x16x128xf32>
    %c0_2 = arith.constant 0 : index
    %c0_3 = arith.constant 0 : index
    %c0_4 = arith.constant 0 : index
    %3 = vector.load %arg3[%c0_2, %c0_3, %c0_4] : memref<1x16x128xf32, #tpu.memory_space<vmem>>, vector<1x16x128xf32>
    %4 = arith.addf %2, %3 : vector<1x16x128xf32>
    %c0_5 = arith.constant 0 : index
    %c0_6 = arith.constant 0 : index
    %c0_7 = arith.constant 0 : index
    %5 = vector.load %arg4[%c0_5, %c0_6, %c0_7] : memref<1x16x128xf32, #tpu.memory_space<vmem>>, vector<1x16x128xf32>
    tpu.vector_store %arg4[%c0_5, %c0_6, %c0_7], %4 {strides = array<i32>} : memref<1x16x128xf32, #tpu.memory_space<vmem>>, vector<1x16x128xf32>,
    return
  }
  func.func @transform_0(%arg0: i32, %arg1: i32) -> (i32, i32, i32) {
    %c0_i32 = arith.constant 0 : i32
    %c0_i32_0 = arith.constant 0 : i32
    return %arg1, %arg0, %c0_i32 : i32, i32, i32
  }
  func.func @transform_1(%arg0: i32, %arg1: i32) -> (i32, i32, i32) {
    %c0_i32 = arith.constant 0 : i32
    %c0_i32_0 = arith.constant 0 : i32
    %c0_i32_1 = arith.constant 0 : i32
    return %c0_i32, %arg0, %c0_i32_0 : i32, i32, i32
  }
  func.func @transform_2(%arg0: i32, %arg1: i32) -> (i32, i32, i32) {
    %c0_i32 = arith.constant 0 : i32
    %c0_i32_0 = arith.constant 0 : i32
    return %arg1, %arg0, %c0_i32 : i32, i32, i32
  }
}

</mosaic_0001>

<bundles_post_ra>
// kernel: tpu_custom_call.1
= control target key start
LH: loop header
LB: loop body
LE: loop exit
PB: predicated region body
PF: predicated region fallthrough
CT: control target
= control target key end

     0   :  { %7 = vsyncpa [#allocation3], 0  ;;  %s776_s0 = inlined_call_operand.hbm [shape: f32[2,16,128], index: 0, kind: input, shape index: {}]   ;;  %s777_s1 = inlined_call_operand.hbm [shape: f32[1,16,128], index: 1, kind: input, shape index: {}]   ;;  %s778_s2 = inlined_call_operand.hbm [shape: f32[2,16,128], index: 2, kind: output, shape index: {}]  }
   0x1   :  { %9 = vsyncpa [#allocation3 + $0x1], 0 }
   0x2   :  { %10 = vsyncpa [#allocation6], 0 }
   0x3   :  { %11 = vsyncpa [#allocation4], 0 }
   0x4   :  { %13 = vsyncpa [#allocation4 + $0x1], 0  ;;  %s589_s9 = smov 0   ;;  %s591_s10 = smov 0  }
   0x5   :  { %s593_s11 = smov 0   ;;  %s595_s12 = smov 0  }
   0x6   :  { %s597_s13 = smov 0   ;;  %s599_s14 = smov 0  }
   0x7 LB: > { %s331_s15 = sadd.s32 4294967295, %s565_s14   ;;  %s332_s16 = sadd.s32 4294967294, %s565_s14   ;;  %s565_s14 = sphi %s599_s14, %s19_s14   ;;  %s561_s13 = sphi %s597_s13, %s798_s13   ;;  %s557_s12 = sphi %s595_s12, %s797_s12   ;;  %s553_s11 = sphi %s593_s11, %s796_s11   ;;  %s549_s10 = sphi %s591_s10, %s795_s10   ;;  %s545_s9 = sphi %s589_s9, %s794_s9  }
   0x8   : > { %p53_p0 = scmp.ne.s32.totalorder %s549_s10, %s545_s9  ;;  %p623_p1 = scmp.eq.s32.totalorder %s331_s15, 0 }
   0x9   : > { %p627_p2 = scmp.eq.s32.totalorder %s331_s15, 1  ;;  %p111_p3 = scmp.eq.s32.totalorder %s332_s16, 1 }
   0xa   : > { %p633_p4 = por %p623_p1, %p53_p0  ;;  %p333_p5 = scmp.ge.s32.totalorder %s565_s14, 1 }
   0xb   : > { %p638_p6 = por %p111_p3, %p53_p0  ;;  %p118_p7 = scmp.lt.s32.totalorder %s565_s14, 3 }
   0xc   : > { %s783_s19 = scalar_select %p633_p4, 1, 0 }
   0xd   : > { %s784_s20 = scalar_select %p638_p6, 1, 0 }
   0xe   : > { %p643_p8 = pnand %p333_p5, %p118_p7  ;;  %s567_s22 = smov [#allocation5]  }
   0xf   : > { %s133_s23 = sshll.u32 %s567_s22, 4  ;;  %s28_s25 = sadd.s32 1, %s561_s13  ;;  %s134_s23 = int_to_ptr.vmem [resolvable:$true] %s133_s23 }
  0x10   : > { %p358_p9 = pneg %p643_p8  ;;  %s438_s26 = scalar_lea.vmem %s134_s23, 256 }
  0x11   : > { %p439_p13 = scmp.ne.s32.totalorder %s134_s23, %s438_s26  ;;  %p446_p5 = scmp.lt.s32.totalorder %s134_s23, %s134_s23 }
  0x12   : > { %p652_p11 = pnand %p358_p9, %p623_p1  ;;  %p447_p7 = scmp.lt.s32.totalorder %s438_s26, %s438_s26 }
  0x14   : > { %p429_p12 = pneg %p652_p11  ;;  %p448_p6 = por %p447_p7, %p446_p5 }
  0x16   : > { %p441_p0 = pnand %p439_p13, %p429_p12 }
  0x18   : > { %p442_p3 = pneg %p441_p0 }
  0x1a   : > { %p449_p4 = pnand %p448_p6, %p442_p3 }
  0x1c   : > { %452 = shalt.err (!%p449_p4)
}
  0x1d   : > { %s780_s27 = smov 128   ;;  %s569_s28 = smov 8  }
  0x1e   : > { %361 = dma.hbm_to_vmem [thread:$0]  (!%p652_p11), %s777_s1, 256, %s134_s23, [#allocation6], %s780_s27, %s780_s27, %s569_s28  }
  0x1f   : > { %p29_p4 = scmp.ge.s32.totalorder %s28_s25, 2  ;;  %s40_s3 = sadd.s32 1, %s553_s11 }
  0x20   : > { %p47_p6 = scmp.ne.s32.totalorder %s553_s11, %s549_s10  ;;  %p48_p9 = scmp.eq.s32.totalorder %s565_s14, 0 }
  0x21   : > { %s800_s25 = smov (%p29_p4, %s28_s25), 0  ;;  %p371_p0 = scmp.lt.s32.totalorder %s565_s14, 2 }
  0x22   : > { %p673_p12 = por %p48_p9, %p47_p6  ;;  %p679_p13 = por %p627_p2, %p47_p6 }
  0x23   : > { %s35_s6 = ssub.s32 %s561_s13, %s800_s25  ;;  %s147_s7 = sand.u32 1, %s553_s11  }
  0x24   : > { %p38_p11 = scmp.eq.s32.totalorder %s35_s6, 0  ;;  %s336_s8 = sshll.u32 %s147_s7, 4 }
  0x25   : > { %s348_s16 = sshll.u32 %s561_s13, 8  ;;  %s151_s26 = scalar_lea.vmem [#allocation2], %s336_s8 }
  0x26   : > { %s688_s15 = scalar_select %p38_p11, %s553_s11, %s40_s3  }
  0x27   : > { %s159_s24 = scalar_lea.hbm %s776_s0, %s348_s16  ;;  %s160_s29 = sshll.u32 %s151_s26, 4  ;;  %s161_s29 = int_to_ptr.vmem [resolvable:$true] %s160_s29 }
  0x28   : > { %p696_p2 = pnand %p371_p0, %p673_p12  ;;  %s148_s30 = scalar_lea.sflag [#allocation3], %s147_s7 }
  0x29   : > { %s466_s6 = scalar_lea.vmem %s161_s29, 256  ;;  %s570_s3 = smov [#allocation2]  }
  0x2a   : > { %p455_p3 = pneg %p696_p2  ;;  %p467_p5 = scmp.ne.s32.totalorder %s161_s29, %s466_s6 }
  0x2b   : > { %s471_s27 = sshll.u32 %s570_s3, 4  ;;  %s472_s27 = int_to_ptr.vmem [resolvable:$false] %s471_s27 }
  0x2c   : > { %p469_p7 = pnand %p467_p5, %p455_p3  ;;  %s473_s16 = scalar_lea.vmem %s472_s27, 512 }
  0x2d   : > { %p474_p6 = scmp.lt.s32.totalorder %s161_s29, %s472_s27  ;;  %p475_p9 = scmp.lt.s32.totalorder %s473_s16, %s466_s6 }
  0x2e   : > { %p470_p4 = pneg %p469_p7 }
  0x2f   : > { %p476_p11 = por %p475_p9, %p474_p6 }
  0x31   : > { %p477_p10 = pnand %p476_p11, %p470_p4 }
  0x33   : > { %480 = shalt.err (!%p477_p10)
}
  0x34   : > { %s790_s4 = smov 128   ;;  %172 = sbr.rel (%p643_p8) target bundleno = 85 (0x55), region = 28 }
  0x35   : > { %365 = dma.hbm_to_vmem [thread:$0]  (!%p696_p2), %s159_s24, 256, %s161_s29, %s148_s30, %s790_s4, %s790_s4, %s569_s28  }
  0x36   : > { %s710_s7 = sand.u32 (!%p643_p8), 1, %s549_s10   ;;  %p791_p12 = scmp.ne.s32.totalorder (!%p643_p8), %s783_s19, 0 }
  0x37   : > { %s340_s27 = sshll.u32 (!%p643_p8), %s710_s7, 4  ;;  %s175_s8 = scalar_lea.sflag (!%p643_p8), [#allocation3], %s710_s7 }
  0x38   : > { %s178_s22 = scalar_lea.vmem (!%p643_p8), [#allocation2], %s340_s27 }
  0x39   : > { %532 = dma.done.wait (%p791_p12), %s175_s8, 256  }
  0x3a   : > { %534 = vsyncadd (%p791_p12), %s175_s8, 4294967040 }
  0x3b   : > { %536 = dma.done.wait (%p623_p1), [#allocation6], 256  }
  0x3c   : > { %538 = vsyncadd (%p623_p1), [#allocation6], 4294967040  ;;  %s202_s21 = scalar_lea.vmem [#allocation7], %s340_s27  ;;  %s349_s23 = sshll.u32 %s557_s12, 8  ;;  %v206_v0 = vld [vmem:[%s178_s22] sm:$0xff]  ;;  %v207_v2 = vld [vmem:[%s178_s22 + $0x8] sm:$0xff] }
  0x3d   : > { %s232_s28 = sshll.u32 %s202_s21, 4  ;;  %v210_v1 = vld [vmem:[#allocation5] sm:$0xff]  ;;  %v208_v3 = vmul.f32 11.313708, %v206_v0  ;;  %v209_v4 = vmul.f32 11.313708, %v207_v2  ;;  %s728_s17 = scalar_lea.hbm %s778_s2, %s349_s23  ;;  %s723_s28 = int_to_ptr.vmem [resolvable:$true] %s232_s28 }
  0x3e   : > { %v211_v5 = vld [vmem:[#allocation5 + $0x8] sm:$0xff]  ;;  %s217_s12 = scalar_lea.sflag [#allocation4], %s710_s7  ;;  %s481_s26 = scalar_lea.vmem %s723_s28, 256 }
  0x3f   : > { %v212_v6 = vadd.f32 %v210_v1, %v208_v3  ;;  %v213_v7 = vadd.f32 %v211_v5, %v209_v4  ;;  %p482_p1 = scmp.ne.s32.totalorder %s723_s28, %s481_s26  ;;  %s571_s29 = smov [#allocation7]  }
  0x40   : > { %s485_s18 = sshll.u32 %s571_s29, 4  ;;  %s486_s18 = int_to_ptr.vmem [resolvable:$false] %s485_s18 }
  0x41   : > { %214 = vst [vmem:[%s202_s21] sm:$0xff] %v212_v6  ;;  %215 = vst [vmem:[%s202_s21 + $0x8] sm:$0xff] %v213_v7  ;;  %p483_p8 = pnand %p482_p1, %p679_p13  ;;  %s487_s30 = scalar_lea.vmem %s486_s18, 512 }
  0x42   : > { %p488_p0 = scmp.lt.s32.totalorder %s723_s28, %s486_s18  ;;  %p489_p2 = scmp.lt.s32.totalorder %s487_s30, %s481_s26 }
  0x43   : > { %p484_p10 = pneg %p483_p8 }
  0x44   : > { %p490_p3 = por %p489_p2, %p488_p0 }
  0x46   : > { %p491_p5 = pnand %p490_p3, %p484_p10 }
  0x48   : > { %494 = shalt.err (!%p491_p5)
}
  0x49   : > { %s495_s6 = scalar_lea.hbm %s728_s17, 256  ;;  %s499_s4 = scalar_lea.hbm %s778_s2, 512 }
  0x4a   : > { %p496_p7 = scmp.ne.s32.totalorder %s728_s17, %s495_s6  ;;  %p500_p9 = scmp.lt.s32.totalorder %s728_s17, %s778_s2 }
  0x4b   : > { %p501_p11 = scmp.lt.s32.totalorder %s499_s4, %s495_s6 }
  0x4c   : > { %p497_p4 = pnand %p496_p7, %p679_p13 }
  0x4d   : > { %p502_p12 = por %p501_p11, %p500_p9 }
  0x4e   : > { %p498_p6 = pneg %p497_p4 }
  0x50   : > { %p503_p1 = pnand %p502_p12, %p498_p6 }
  0x52   : > { %506 = shalt.err (!%p503_p1)
}
  0x53   : > { %s572_s22 = smov 128   ;;  %s573_s21 = smov 8  }
  0x54   : > { %356 = dma.vmem_to_hbm [thread:$0]  (%p679_p13), %s723_s28, 256, %s728_s17, %s217_s12, %s572_s22, %s572_s22, %s573_s21  }
  0x55 PF: > { %s247_s23 = sand.u32 1, %s545_s9   ;;  %p792_p8 = scmp.ne.s32.totalorder %s784_s20, 0 }
  0x56   : > { %p793_p10 = scmp.ge.s32.totalorder %s565_s14, 2  ;;  %s248_s19 = scalar_lea.sflag [#allocation4], %s247_s23 }
  0x58   : > { %p367_p0 = pnand %p793_p10, %p792_p8 }
  0x5a   : > { %p368_p2 = pneg %p367_p0 }
  0x5c   : > { %540 = dma.done.wait (%p368_p2), %s248_s19, 256  }
  0x5d   : > { %542 = vsyncadd (%p368_p2), %s248_s19, 4294967040  ;;  %s19_s14 = sadd.s32 1, %s565_s14   ;;  %s794_s9 = smov %s549_s10 }
  0x5e   : > { %p16_p3 = scmp.ge.s32.totalorder %s19_s14, 4   ;;  %s795_s10 = smov %s553_s11 }
  0x5f   : > { %s796_s11 = smov %s688_s15  ;;  %s797_s12 = smov %s561_s13 }
  0x60   : > { %s798_s13 = smov %s800_s25  ;;  %18 = sbr.rel (!%p16_p3) target bundleno = 7 (0x7), region = 78 }
  0x65   :  { %253 = vsyncpa [#allocation3], 1 }
  0x66   :  { %255 = vsyncpa [#allocation3 + $0x1], 1 }
  0x67   :  { %256 = vsyncpa [#allocation6], 1 }
  0x68   :  { %257 = vsyncpa [#allocation4], 1 }
  0x69   :  { %259 = vsyncpa [#allocation4 + $0x1], 1 }

</bundles_post_ra>
